<compile_context>
chip_gen: v6e
topology: v6e:2x2x1
jax: 0.10.0
libtpu: 0.0.40
codegen_flags: <defaults>
</compile_context>

<pallas_src>
import functools

import jax
import jax.numpy as jnp
from jax.experimental import pallas as pl
from jax.experimental.pallas import tpu as pltpu

EPS = 1e-5


# ---------------------------------------------------------------------------
# Kernel
# ---------------------------------------------------------------------------
def _bn_scale_shift(h, gamma, beta):
    """Training-mode BatchNorm1d folded to one (scale, shift).

    f32 throughout; centered (two-pass) variance to avoid the catastrophic
    cancellation of the E[h^2]-mean^2 form when |mean| >> std.
    """
    inv_n = 1.0 / h.shape[0]
    mean = jnp.sum(h, axis=0, keepdims=True) * inv_n
    d = h - mean
    var = jnp.sum(d * d, axis=0, keepdims=True) * inv_n
    scale = gamma * jax.lax.rsqrt(var + EPS)
    shift = beta - mean * scale
    return scale, shift


def dnn_mapping_kernel(x_ref, y_ref, w1_ref, w2_ref, w3_ref, w4_ref,
                       bn_in_ref, bn_emb_ref, bn_outy_ref,
                       out_enh_ref, out_tgt_ref, *, negative_slope):
    """Fused forward: BN(x) -> [Linear -> BN -> LeakyReLU]x3 -> Linear -> BN, plus BN(y).

    All BatchNorms are training-mode (batch statistics).  Linear biases and the
    input-BN shift are omitted: per-feature constants added right before a
    training-mode BatchNorm cancel exactly in (h - mean).
    # TODO(synk): nn.Dropout treated as identity — torch training-mode dropout
    # RNG is not reproducible in-kernel.
    """
    f32 = jnp.float32
    wdtype = w1_ref.dtype  # bf16 in production, f32 in the exactness-check variant

    def bn_apply(h, gamma, beta):
        scale, shift = _bn_scale_shift(h, gamma, beta)
        return h * scale + shift

    def leaky(h):
        return jnp.where(h >= 0, h, negative_slope * h)

    def mxu_dot(h, w_ref):
        # Narrow-precision operands on the MXU, f32 accumulation.
        return jnp.dot(h.astype(wdtype), w_ref[...], preferred_element_type=f32)

    bn_in = bn_in_ref[...].astype(f32)      # [2, D_in]  : g0, b0 (b0 cancels)
    bn_emb = bn_emb_ref[...].astype(f32)    # [6, D_emb] : g1, b1, g2, b2, g3, b3
    bn_oy = bn_outy_ref[...].astype(f32)    # [4, D_out] : g4, b4, gy, by

    # ---- enhanced path ----
    x = x_ref[...].astype(f32)
    # Input BN: shift cancels in the next training-mode BN; only the scale matters.
    scale0, _ = _bn_scale_shift(x, bn_in[0:1, :], bn_in[1:2, :])
    # TODO(synk): for N >> 128, fold scale0 into W1's rows instead of scaling x.
    h = mxu_dot(x * scale0, w1_ref)
    h = leaky(bn_apply(h, bn_emb[0:1, :], bn_emb[1:2, :]))
    h = mxu_dot(h, w2_ref)
    h = leaky(bn_apply(h, bn_emb[2:3, :], bn_emb[3:4, :]))
    h = mxu_dot(h, w3_ref)
    h = leaky(bn_apply(h, bn_emb[4:5, :], bn_emb[5:6, :]))
    h = mxu_dot(h, w4_ref)
    out_enh_ref[...] = bn_apply(h, bn_oy[0:1, :], bn_oy[1:2, :]).astype(out_enh_ref.dtype)

    # ---- target path (independent BN over y), fused into the same launch ----
    y = y_ref[...].astype(f32)
    out_tgt_ref[...] = bn_apply(y, bn_oy[2:3, :], bn_oy[3:4, :]).astype(out_tgt_ref.dtype)


# ---------------------------------------------------------------------------
# One-time parameter packing (do NOT call per step)
# ---------------------------------------------------------------------------
def prepare_params(params, *, weight_dtype=jnp.bfloat16):
    """Cast weights for the MXU and stack the tiny BN affine vectors.

    Hoisted out of the forward path: call once at parameter-setup time.
    """
    f32 = jnp.float32

    def vec(v):
        return jnp.asarray(v, f32).reshape(1, -1)

    return {
        "w1": jnp.asarray(params["w1"], weight_dtype),
        "w2": jnp.asarray(params["w2"], weight_dtype),
        "w3": jnp.asarray(params["w3"], weight_dtype),
        "w4": jnp.asarray(params["w4"], weight_dtype),
        "bn_in": jnp.concatenate([vec(params["g0"]), vec(params["b0"])], axis=0),
        "bn_emb": jnp.concatenate(
            [vec(params[k]) for k in ("g1", "b1", "g2", "b2", "g3", "b3")], axis=0),
        "bn_outy": jnp.concatenate(
            [vec(params[k]) for k in ("g4", "b4", "gy", "by")], axis=0),
    }


# ---------------------------------------------------------------------------
# Forward wrapper
# ---------------------------------------------------------------------------
def _pick_vmem_limit_bytes():
    """Per-generation VMEM budget: ~80% of physical, capped at 112 MiB."""
    cap = None
    try:
        cap = getattr(pltpu.get_tpu_info(), "vmem_capacity_bytes", None)
    except Exception:
        cap = None
    if not cap:
        cap = 64 * 1024 * 1024  # conservative fallback (v7x physical per TC)
    return int(min(cap * 0.8, 112 * 1024 * 1024))


def dnn_mapping_forward(x, y, packed, *, negative_slope):
    """x: [N, dim_in], y: [N, dim_out] -> (out_enh [N, dim_out], out_tgt [N, dim_out]).

    Training-mode forward (DNN_Mapping.forward(..., istraining=True)).
    x / y are consumed at native shape & dtype — no wrapper pad/cast/slice
    passes, no post-kernel slicing.  Flatten all frames into one batch N before
    calling: one launch amortizes overhead and BN statistics are batch-global.
    # TODO(synk): eval-mode (running-statistics) BatchNorm path not implemented.
    """
    n, dim_in = x.shape
    dim_out = y.shape[1]
    del dim_in  # shapes taken from the refs inside the kernel

    vmem = pl.BlockSpec(memory_space=pltpu.MemorySpace.VMEM)
    kernel = functools.partial(dnn_mapping_kernel, negative_slope=negative_slope)

    out_enh, out_tgt = pl.pallas_call(
        kernel,
        out_shape=(jax.ShapeDtypeStruct((n, dim_out), x.dtype),
                   jax.ShapeDtypeStruct((n, dim_out), y.dtype)),
        in_specs=[vmem] * 9,
        out_specs=(vmem, vmem),
        compiler_params=pltpu.CompilerParams(
            vmem_limit_bytes=_pick_vmem_limit_bytes()),
    )(x, y, packed["w1"], packed["w2"], packed["w3"], packed["w4"],
      packed["bn_in"], packed["bn_emb"], packed["bn_outy"])
    return out_enh, out_tgt


# ---------------------------------------------------------------------------
# Parameter construction + pure-JAX reference (PyTorch-equivalent math).
# ---------------------------------------------------------------------------
def _xavier_normal(key, fan_in, fan_out):
    std = (2.0 / (fan_in + fan_out)) ** 0.5
    # Stored as (in_features, out_features) == W.T so the kernel does h @ W.
    return std * jax.random.normal(key, (fan_in, fan_out), jnp.float32)


def make_params(key, dim_in, dim_emb, dim_out):
    keys = jax.random.split(key, 8)
    p = {}
    # BatchNorm affine params (torch default init: gamma=1, beta=0).
    p["g0"], p["b0"] = jnp.ones((1, dim_in)), jnp.zeros((1, dim_in))
    p["g1"], p["b1"] = jnp.ones((1, dim_emb)), jnp.zeros((1, dim_emb))
    p["g2"], p["b2"] = jnp.ones((1, dim_emb)), jnp.zeros((1, dim_emb))
    p["g3"], p["b3"] = jnp.ones((1, dim_emb)), jnp.zeros((1, dim_emb))
    p["g4"], p["b4"] = jnp.ones((1, dim_out)), jnp.zeros((1, dim_out))
    p["gy"], p["by"] = jnp.ones((1, dim_out)), jnp.zeros((1, dim_out))
    # Linear weights: xavier_normal (as in the module); biases: torch default uniform.
    p["w1"] = _xavier_normal(keys[0], dim_in, dim_emb)
    p["w2"] = _xavier_normal(keys[1], dim_emb, dim_emb)
    p["w3"] = _xavier_normal(keys[2], dim_emb, dim_emb)
    p["w4"] = _xavier_normal(keys[3], dim_emb, dim_out)
    p["bi1"] = jax.random.uniform(keys[4], (1, dim_emb), jnp.float32,
                                  -1.0 / dim_in ** 0.5, 1.0 / dim_in ** 0.5)
    p["bi2"] = jax.random.uniform(keys[5], (1, dim_emb), jnp.float32,
                                  -1.0 / dim_emb ** 0.5, 1.0 / dim_emb ** 0.5)
    p["bi3"] = jax.random.uniform(keys[6], (1, dim_emb), jnp.float32,
                                  -1.0 / dim_emb ** 0.5, 1.0 / dim_emb ** 0.5)
    p["bi4"] = jax.random.uniform(keys[7], (1, dim_out), jnp.float32,
                                  -1.0 / dim_emb ** 0.5, 1.0 / dim_emb ** 0.5)
    return p


def _bn_ref(h, gamma, beta):
    mean = jnp.mean(h, axis=0, keepdims=True)
    var = jnp.mean((h - mean) ** 2, axis=0, keepdims=True)
    return gamma * (h - mean) * jax.lax.rsqrt(var + EPS) + beta


def reference_forward(x, y, p, *, negative_slope):
    """Pure-JAX f32 reference of the exact PyTorch math (with Linear biases)."""
    def leaky(h):
        return jnp.where(h >= 0, h, negative_slope * h)
    h = _bn_ref(x, p["g0"], p["b0"])
    h = leaky(_bn_ref(h @ p["w1"] + p["bi1"], p["g1"], p["b1"]))
    h = leaky(_bn_ref(h @ p["w2"] + p["bi2"], p["g2"], p["b2"]))
    h = leaky(_bn_ref(h @ p["w3"] + p["bi3"], p["g3"], p["b3"]))
    out_enh = _bn_ref(h @ p["w4"] + p["bi4"], p["g4"], p["b4"])
    out_tgt = _bn_ref(y, p["gy"], p["by"])
    return out_enh, out_tgt


if __name__ == "__main__":
    # Small synthetic config (para.*): dim_in=64, dim_embeding=128, dim_out=64,
    # dropout=0.1 (inert), negative_slope=0.01, batch=16.
    dim_in, dim_emb, dim_out = 64, 128, 64
    negative_slope = 0.01
    batch = 16

    key = jax.random.PRNGKey(0)
    kx, ky, kp = jax.random.split(key, 3)
    x = jax.random.normal(kx, (batch, dim_in), jnp.float32)
    y = jax.random.normal(ky, (batch, dim_out), jnp.float32)
    params = make_params(kp, dim_in, dim_emb, dim_out)

    ref_enh, ref_tgt = reference_forward(x, y, params, negative_slope=negative_slope)

    # 1) f32-weight kernel variant: tight check so bf16 rounding can't hide bugs.
    packed_f32 = prepare_params(params, weight_dtype=jnp.float32)
    enh32, tgt32 = dnn_mapping_forward(x, y, packed_f32, negative_slope=negative_slope)
    jax.block_until_ready((enh32, tgt32))
    assert enh32.shape == (batch, dim_out) and tgt32.shape == (batch, dim_out)
    assert jnp.allclose(enh32, ref_enh, rtol=2e-3, atol=2e-3)
    assert jnp.allclose(tgt32, ref_tgt, rtol=1e-4, atol=1e-4)

    # 2) Production bf16-MXU variant.
    packed_bf16 = prepare_params(params, weight_dtype=jnp.bfloat16)
    out_enh, out_tgt = dnn_mapping_forward(x, y, packed_bf16, negative_slope=negative_slope)
    jax.block_until_ready((out_enh, out_tgt))
    assert out_enh.shape == (batch, dim_out) and out_tgt.shape == (batch, dim_out)
    assert jnp.allclose(out_enh, ref_enh, rtol=5e-2, atol=5e-2)
    assert jnp.allclose(out_tgt, ref_tgt, rtol=1e-4, atol=1e-4)

    print("KERNEL_OK")
</pallas_src>

<mosaic_0001>
module attributes {stable_mosaic.version = 11 : i64} {
  func.func @dnn_mapping_kernel(%arg0: memref<16x64xf32, #tpu.memory_space<vmem>>, %arg1: memref<16x64xf32, #tpu.memory_space<vmem>>, %arg2: memref<64x128xf32, #tpu.memory_space<vmem>>, %arg3: memref<128x128xf32, #tpu.memory_space<vmem>>, %arg4: memref<128x128xf32, #tpu.memory_space<vmem>>, %arg5: memref<128x64xf32, #tpu.memory_space<vmem>>, %arg6: memref<2x64xf32, #tpu.memory_space<vmem>>, %arg7: memref<6x128xf32, #tpu.memory_space<vmem>>, %arg8: memref<4x64xf32, #tpu.memory_space<vmem>>, %arg9: memref<16x64xf32, #tpu.memory_space<vmem>>, %arg10: memref<16x64xf32, #tpu.memory_space<vmem>>) attributes {dimension_semantics = [], scalar_prefetch = 0 : i64, scratch_operands = 0 : i64, tpu.core_type = #tpu.core_type<tc>} {
    %c0 = arith.constant 0 : index
    %c0_0 = arith.constant 0 : index
    %0 = vector.load %arg6[%c0, %c0_0] : memref<2x64xf32, #tpu.memory_space<vmem>>, vector<2x64xf32>
    %c0_1 = arith.constant 0 : index
    %c0_2 = arith.constant 0 : index
    %1 = vector.load %arg7[%c0_1, %c0_2] : memref<6x128xf32, #tpu.memory_space<vmem>>, vector<6x128xf32>
    %c0_3 = arith.constant 0 : index
    %c0_4 = arith.constant 0 : index
    %2 = vector.load %arg8[%c0_3, %c0_4] : memref<4x64xf32, #tpu.memory_space<vmem>>, vector<4x64xf32>
    %c0_5 = arith.constant 0 : index
    %c0_6 = arith.constant 0 : index
    %3 = vector.load %arg0[%c0_5, %c0_6] : memref<16x64xf32, #tpu.memory_space<vmem>>, vector<16x64xf32>
    %4 = vector.extract_strided_slice %0 {offsets = [0, 0], sizes = [1, 64], strides = [1, 1]} : vector<2x64xf32> to vector<1x64xf32>
    %cst = arith.constant dense<0.000000e+00> : vector<64xf32>
    %5 = vector.multi_reduction <add>, %3, %cst [0] : vector<16x64xf32> to vector<64xf32>
    %6 = vector.shape_cast %5 : vector<64xf32> to vector<1x64xf32>
    %cst_7 = arith.constant 6.250000e-02 : f32
    %7 = vector.broadcast %cst_7 : f32 to vector<1x64xf32>
    %8 = arith.mulf %6, %7 : vector<1x64xf32>
    %9 = vector.broadcast %8 : vector<1x64xf32> to vector<16x64xf32>
    %10 = arith.subf %3, %9 : vector<16x64xf32>
    %11 = arith.mulf %10, %10 : vector<16x64xf32>
    %cst_8 = arith.constant dense<0.000000e+00> : vector<64xf32>
    %12 = vector.multi_reduction <add>, %11, %cst_8 [0] : vector<16x64xf32> to vector<64xf32>
    %13 = vector.shape_cast %12 : vector<64xf32> to vector<1x64xf32>
    %cst_9 = arith.constant 6.250000e-02 : f32
    %14 = vector.broadcast %cst_9 : f32 to vector<1x64xf32>
    %15 = arith.mulf %13, %14 : vector<1x64xf32>
    %cst_10 = arith.constant 9.99999974E-6 : f32
    %16 = vector.broadcast %cst_10 : f32 to vector<1x64xf32>
    %17 = arith.addf %15, %16 : vector<1x64xf32>
    %18 = math.rsqrt %17 : vector<1x64xf32>
    %19 = arith.mulf %4, %18 : vector<1x64xf32>
    %20 = vector.broadcast %19 : vector<1x64xf32> to vector<16x64xf32>
    %21 = arith.mulf %3, %20 : vector<16x64xf32>
    %c0_11 = arith.constant 0 : index
    %c0_12 = arith.constant 0 : index
    %22 = vector.load %arg2[%c0_11, %c0_12] : memref<64x128xf32, #tpu.memory_space<vmem>>, vector<64x128xf32>
    %cst_13 = arith.constant dense<0.000000e+00> : vector<16x128xf32>
    %23 = tpu.matmul %21, %22, %cst_13 {dimension_numbers = #tpu.dot_dimension_numbers<[1], [0], [0], [1], [0, 0, 1, 1], [], []>} : vector<16x64xf32>, vector<64x128xf32>, vector<16x128xf32> -> vector<16x128xf32>
    %24 = vector.extract_strided_slice %1 {offsets = [0, 0], sizes = [1, 128], strides = [1, 1]} : vector<6x128xf32> to vector<1x128xf32>
    %25 = vector.extract_strided_slice %1 {offsets = [1, 0], sizes = [1, 128], strides = [1, 1]} : vector<6x128xf32> to vector<1x128xf32>
    %cst_14 = arith.constant dense<0.000000e+00> : vector<128xf32>
    %26 = vector.multi_reduction <add>, %23, %cst_14 [0] : vector<16x128xf32> to vector<128xf32>
    %27 = vector.shape_cast %26 : vector<128xf32> to vector<1x128xf32>
    %cst_15 = arith.constant 6.250000e-02 : f32
    %28 = vector.broadcast %cst_15 : f32 to vector<1x128xf32>
    %29 = arith.mulf %27, %28 : vector<1x128xf32>
    %30 = vector.broadcast %29 : vector<1x128xf32> to vector<16x128xf32>
    %31 = arith.subf %23, %30 : vector<16x128xf32>
    %32 = arith.mulf %31, %31 : vector<16x128xf32>
    %cst_16 = arith.constant dense<0.000000e+00> : vector<128xf32>
    %33 = vector.multi_reduction <add>, %32, %cst_16 [0] : vector<16x128xf32> to vector<128xf32>
    %34 = vector.shape_cast %33 : vector<128xf32> to vector<1x128xf32>
    %cst_17 = arith.constant 6.250000e-02 : f32
    %35 = vector.broadcast %cst_17 : f32 to vector<1x128xf32>
    %36 = arith.mulf %34, %35 : vector<1x128xf32>
    %cst_18 = arith.constant 9.99999974E-6 : f32
    %37 = vector.broadcast %cst_18 : f32 to vector<1x128xf32>
    %38 = arith.addf %36, %37 : vector<1x128xf32>
    %39 = math.rsqrt %38 : vector<1x128xf32>
    %40 = arith.mulf %24, %39 : vector<1x128xf32>
    %41 = arith.mulf %29, %40 : vector<1x128xf32>
    %42 = arith.subf %25, %41 : vector<1x128xf32>
    %43 = vector.broadcast %40 : vector<1x128xf32> to vector<16x128xf32>
    %44 = arith.mulf %23, %43 : vector<16x128xf32>
    %45 = vector.broadcast %42 : vector<1x128xf32> to vector<16x128xf32>
    %46 = arith.addf %44, %45 : vector<16x128xf32>
    %cst_19 = arith.constant 0.000000e+00 : f32
    %47 = vector.broadcast %cst_19 : f32 to vector<16x128xf32>
    %48 = arith.cmpf oge, %46, %47 : vector<16x128xf32>
    %cst_20 = arith.constant 0.00999999977 : f32
    %49 = vector.broadcast %cst_20 : f32 to vector<16x128xf32>
    %50 = arith.mulf %49, %46 : vector<16x128xf32>
    %51 = arith.select %48, %46, %50 : vector<16x128xi1>, vector<16x128xf32>
    %c0_21 = arith.constant 0 : index
    %c0_22 = arith.constant 0 : index
    %52 = vector.load %arg3[%c0_21, %c0_22] : memref<128x128xf32, #tpu.memory_space<vmem>>, vector<128x128xf32>
    %cst_23 = arith.constant dense<0.000000e+00> : vector<16x128xf32>
    %53 = tpu.matmul %51, %52, %cst_23 {dimension_numbers = #tpu.dot_dimension_numbers<[1], [0], [0], [1], [0, 0, 1, 1], [], []>} : vector<16x128xf32>, vector<128x128xf32>, vector<16x128xf32> -> vector<16x128xf32>
    %54 = vector.extract_strided_slice %1 {offsets = [2, 0], sizes = [1, 128], strides = [1, 1]} : vector<6x128xf32> to vector<1x128xf32>
    %55 = vector.extract_strided_slice %1 {offsets = [3, 0], sizes = [1, 128], strides = [1, 1]} : vector<6x128xf32> to vector<1x128xf32>
    %cst_24 = arith.constant dense<0.000000e+00> : vector<128xf32>
    %56 = vector.multi_reduction <add>, %53, %cst_24 [0] : vector<16x128xf32> to vector<128xf32>
    %57 = vector.shape_cast %56 : vector<128xf32> to vector<1x128xf32>
    %cst_25 = arith.constant 6.250000e-02 : f32
    %58 = vector.broadcast %cst_25 : f32 to vector<1x128xf32>
    %59 = arith.mulf %57, %58 : vector<1x128xf32>
    %60 = vector.broadcast %59 : vector<1x128xf32> to vector<16x128xf32>
    %61 = arith.subf %53, %60 : vector<16x128xf32>
    %62 = arith.mulf %61, %61 : vector<16x128xf32>
    %cst_26 = arith.constant dense<0.000000e+00> : vector<128xf32>
    %63 = vector.multi_reduction <add>, %62, %cst_26 [0] : vector<16x128xf32> to vector<128xf32>
    %64 = vector.shape_cast %63 : vector<128xf32> to vector<1x128xf32>
    %cst_27 = arith.constant 6.250000e-02 : f32
    %65 = vector.broadcast %cst_27 : f32 to vector<1x128xf32>
    %66 = arith.mulf %64, %65 : vector<1x128xf32>
    %cst_28 = arith.constant 9.99999974E-6 : f32
    %67 = vector.broadcast %cst_28 : f32 to vector<1x128xf32>
    %68 = arith.addf %66, %67 : vector<1x128xf32>
    %69 = math.rsqrt %68 : vector<1x128xf32>
    %70 = arith.mulf %54, %69 : vector<1x128xf32>
    %71 = arith.mulf %59, %70 : vector<1x128xf32>
    %72 = arith.subf %55, %71 : vector<1x128xf32>
    %73 = vector.broadcast %70 : vector<1x128xf32> to vector<16x128xf32>
    %74 = arith.mulf %53, %73 : vector<16x128xf32>
    %75 = vector.broadcast %72 : vector<1x128xf32> to vector<16x128xf32>
    %76 = arith.addf %74, %75 : vector<16x128xf32>
    %cst_29 = arith.constant 0.000000e+00 : f32
    %77 = vector.broadcast %cst_29 : f32 to vector<16x128xf32>
    %78 = arith.cmpf oge, %76, %77 : vector<16x128xf32>
    %cst_30 = arith.constant 0.00999999977 : f32
    %79 = vector.broadcast %cst_30 : f32 to vector<16x128xf32>
    %80 = arith.mulf %79, %76 : vector<16x128xf32>
    %81 = arith.select %78, %76, %80 : vector<16x128xi1>, vector<16x128xf32>
    %c0_31 = arith.constant 0 : index
    %c0_32 = arith.constant 0 : index
    %82 = vector.load %arg4[%c0_31, %c0_32] : memref<128x128xf32, #tpu.memory_space<vmem>>, vector<128x128xf32>
    %cst_33 = arith.constant dense<0.000000e+00> : vector<16x128xf32>
    %83 = tpu.matmul %81, %82, %cst_33 {dimension_numbers = #tpu.dot_dimension_numbers<[1], [0], [0], [1], [0, 0, 1, 1], [], []>} : vector<16x128xf32>, vector<128x128xf32>, vector<16x128xf32> -> vector<16x128xf32>
    %84 = vector.extract_strided_slice %1 {offsets = [4, 0], sizes = [1, 128], strides = [1, 1]} : vector<6x128xf32> to vector<1x128xf32>
    %85 = vector.extract_strided_slice %1 {offsets = [5, 0], sizes = [1, 128], strides = [1, 1]} : vector<6x128xf32> to vector<1x128xf32>
    %cst_34 = arith.constant dense<0.000000e+00> : vector<128xf32>
    %86 = vector.multi_reduction <add>, %83, %cst_34 [0] : vector<16x128xf32> to vector<128xf32>
    %87 = vector.shape_cast %86 : vector<128xf32> to vector<1x128xf32>
    %cst_35 = arith.constant 6.250000e-02 : f32
    %88 = vector.broadcast %cst_35 : f32 to vector<1x128xf32>
    %89 = arith.mulf %87, %88 : vector<1x128xf32>
    %90 = vector.broadcast %89 : vector<1x128xf32> to vector<16x128xf32>
    %91 = arith.subf %83, %90 : vector<16x128xf32>
    %92 = arith.mulf %91, %91 : vector<16x128xf32>
    %cst_36 = arith.constant dense<0.000000e+00> : vector<128xf32>
    %93 = vector.multi_reduction <add>, %92, %cst_36 [0] : vector<16x128xf32> to vector<128xf32>
    %94 = vector.shape_cast %93 : vector<128xf32> to vector<1x128xf32>
    %cst_37 = arith.constant 6.250000e-02 : f32
    %95 = vector.broadcast %cst_37 : f32 to vector<1x128xf32>
    %96 = arith.mulf %94, %95 : vector<1x128xf32>
    %cst_38 = arith.constant 9.99999974E-6 : f32
    %97 = vector.broadcast %cst_38 : f32 to vector<1x128xf32>
    %98 = arith.addf %96, %97 : vector<1x128xf32>
    %99 = math.rsqrt %98 : vector<1x128xf32>
    %100 = arith.mulf %84, %99 : vector<1x128xf32>
    %101 = arith.mulf %89, %100 : vector<1x128xf32>
    %102 = arith.subf %85, %101 : vector<1x128xf32>
    %103 = vector.broadcast %100 : vector<1x128xf32> to vector<16x128xf32>
    %104 = arith.mulf %83, %103 : vector<16x128xf32>
    %105 = vector.broadcast %102 : vector<1x128xf32> to vector<16x128xf32>
    %106 = arith.addf %104, %105 : vector<16x128xf32>
    %cst_39 = arith.constant 0.000000e+00 : f32
    %107 = vector.broadcast %cst_39 : f32 to vector<16x128xf32>
    %108 = arith.cmpf oge, %106, %107 : vector<16x128xf32>
    %cst_40 = arith.constant 0.00999999977 : f32
    %109 = vector.broadcast %cst_40 : f32 to vector<16x128xf32>
    %110 = arith.mulf %109, %106 : vector<16x128xf32>
    %111 = arith.select %108, %106, %110 : vector<16x128xi1>, vector<16x128xf32>
    %c0_41 = arith.constant 0 : index
    %c0_42 = arith.constant 0 : index
    %112 = vector.load %arg5[%c0_41, %c0_42] : memref<128x64xf32, #tpu.memory_space<vmem>>, vector<128x64xf32>
    %cst_43 = arith.constant dense<0.000000e+00> : vector<16x64xf32>
    %113 = tpu.matmul %111, %112, %cst_43 {dimension_numbers = #tpu.dot_dimension_numbers<[1], [0], [0], [1], [0, 0, 1, 1], [], []>} : vector<16x128xf32>, vector<128x64xf32>, vector<16x64xf32> -> vector<16x64xf32>
    %114 = vector.extract_strided_slice %2 {offsets = [0, 0], sizes = [1, 64], strides = [1, 1]} : vector<4x64xf32> to vector<1x64xf32>
    %115 = vector.extract_strided_slice %2 {offsets = [1, 0], sizes = [1, 64], strides = [1, 1]} : vector<4x64xf32> to vector<1x64xf32>
    %cst_44 = arith.constant dense<0.000000e+00> : vector<64xf32>
    %116 = vector.multi_reduction <add>, %113, %cst_44 [0] : vector<16x64xf32> to vector<64xf32>
    %117 = vector.shape_cast %116 : vector<64xf32> to vector<1x64xf32>
    %cst_45 = arith.constant 6.250000e-02 : f32
    %118 = vector.broadcast %cst_45 : f32 to vector<1x64xf32>
    %119 = arith.mulf %117, %118 : vector<1x64xf32>
    %120 = vector.broadcast %119 : vector<1x64xf32> to vector<16x64xf32>
    %121 = arith.subf %113, %120 : vector<16x64xf32>
    %122 = arith.mulf %121, %121 : vector<16x64xf32>
    %cst_46 = arith.constant dense<0.000000e+00> : vector<64xf32>
    %123 = vector.multi_reduction <add>, %122, %cst_46 [0] : vector<16x64xf32> to vector<64xf32>
    %124 = vector.shape_cast %123 : vector<64xf32> to vector<1x64xf32>
    %cst_47 = arith.constant 6.250000e-02 : f32
    %125 = vector.broadcast %cst_47 : f32 to vector<1x64xf32>
    %126 = arith.mulf %124, %125 : vector<1x64xf32>
    %cst_48 = arith.constant 9.99999974E-6 : f32
    %127 = vector.broadcast %cst_48 : f32 to vector<1x64xf32>
    %128 = arith.addf %126, %127 : vector<1x64xf32>
    %129 = math.rsqrt %128 : vector<1x64xf32>
    %130 = arith.mulf %114, %129 : vector<1x64xf32>
    %131 = arith.mulf %119, %130 : vector<1x64xf32>
    %132 = arith.subf %115, %131 : vector<1x64xf32>
    %133 = vector.broadcast %130 : vector<1x64xf32> to vector<16x64xf32>
    %134 = arith.mulf %113, %133 : vector<16x64xf32>
    %135 = vector.broadcast %132 : vector<1x64xf32> to vector<16x64xf32>
    %136 = arith.addf %134, %135 : vector<16x64xf32>
    %c0_49 = arith.constant 0 : index
    %c0_50 = arith.constant 0 : index
    %137 = vector.load %arg9[%c0_49, %c0_50] : memref<16x64xf32, #tpu.memory_space<vmem>>, vector<16x64xf32>
    tpu.vector_store %arg9[%c0_49, %c0_50], %136 {strides = array<i32>} : memref<16x64xf32, #tpu.memory_space<vmem>>, vector<16x64xf32>,
    %c0_51 = arith.constant 0 : index
    %c0_52 = arith.constant 0 : index
    %138 = vector.load %arg1[%c0_51, %c0_52] : memref<16x64xf32, #tpu.memory_space<vmem>>, vector<16x64xf32>
    %139 = vector.extract_strided_slice %2 {offsets = [2, 0], sizes = [1, 64], strides = [1, 1]} : vector<4x64xf32> to vector<1x64xf32>
    %140 = vector.extract_strided_slice %2 {offsets = [3, 0], sizes = [1, 64], strides = [1, 1]} : vector<4x64xf32> to vector<1x64xf32>
    %cst_53 = arith.constant dense<0.000000e+00> : vector<64xf32>
    %141 = vector.multi_reduction <add>, %138, %cst_53 [0] : vector<16x64xf32> to vector<64xf32>
    %142 = vector.shape_cast %141 : vector<64xf32> to vector<1x64xf32>
    %cst_54 = arith.constant 6.250000e-02 : f32
    %143 = vector.broadcast %cst_54 : f32 to vector<1x64xf32>
    %144 = arith.mulf %142, %143 : vector<1x64xf32>
    %145 = vector.broadcast %144 : vector<1x64xf32> to vector<16x64xf32>
    %146 = arith.subf %138, %145 : vector<16x64xf32>
    %147 = arith.mulf %146, %146 : vector<16x64xf32>
    %cst_55 = arith.constant dense<0.000000e+00> : vector<64xf32>
    %148 = vector.multi_reduction <add>, %147, %cst_55 [0] : vector<16x64xf32> to vector<64xf32>
    %149 = vector.shape_cast %148 : vector<64xf32> to vector<1x64xf32>
    %cst_56 = arith.constant 6.250000e-02 : f32
    %150 = vector.broadcast %cst_56 : f32 to vector<1x64xf32>
    %151 = arith.mulf %149, %150 : vector<1x64xf32>
    %cst_57 = arith.constant 9.99999974E-6 : f32
    %152 = vector.broadcast %cst_57 : f32 to vector<1x64xf32>
    %153 = arith.addf %151, %152 : vector<1x64xf32>
    %154 = math.rsqrt %153 : vector<1x64xf32>
    %155 = arith.mulf %139, %154 : vector<1x64xf32>
    %156 = arith.mulf %144, %155 : vector<1x64xf32>
    %157 = arith.subf %140, %156 : vector<1x64xf32>
    %158 = vector.broadcast %155 : vector<1x64xf32> to vector<16x64xf32>
    %159 = arith.mulf %138, %158 : vector<16x64xf32>
    %160 = vector.broadcast %157 : vector<1x64xf32> to vector<16x64xf32>
    %161 = arith.addf %159, %160 : vector<16x64xf32>
    %c0_58 = arith.constant 0 : index
    %c0_59 = arith.constant 0 : index
    %162 = vector.load %arg10[%c0_58, %c0_59] : memref<16x64xf32, #tpu.memory_space<vmem>>, vector<16x64xf32>
    tpu.vector_store %arg10[%c0_58, %c0_59], %161 {strides = array<i32>} : memref<16x64xf32, #tpu.memory_space<vmem>>, vector<16x64xf32>,
    return
  }
}

</mosaic_0001>

<bundles_post_ra>
// kernel: tpu_custom_call.1
= control target key start
LH: loop header
LB: loop body
LE: loop exit
PB: predicated region body
PF: predicated region fallthrough
CT: control target
= control target key end

     0   :  { %16 = vsyncpa [#allocation3], 0  ;;  %s1333_s0 = inlined_call_operand.hbm [shape: f32[16,64], index: 0, kind: input, shape index: {}]   ;;  %s1334_s1 = inlined_call_operand.hbm [shape: f32[16,64], index: 1, kind: input, shape index: {}]   ;;  %s1335_s2 = inlined_call_operand.vmem [shape: f32[64,128], index: 2, kind: input, shape index: {}]   ;;  %s1336_s3 = inlined_call_operand.vmem [shape: f32[128,128], index: 3, kind: input, shape index: {}]   ;;  %s1337_s4 = inlined_call_operand.hbm [shape: f32[128,128], index: 4, kind: input, shape index: {}]   ;;  %s1338_s5 = inlined_call_operand.vmem [shape: f32[128,64], index: 5, kind: input, shape index: {}]   ;;  %s1339_s6 = inlined_call_operand.vmem [shape: f32[2,64], index: 6, kind: input, shape index: {}]   ;;  %s1340_s7 = inlined_call_operand.vmem [shape: f32[6,128], index: 7, kind: input, shape index: {}]   ;;  %s1341_s8 = inlined_call_operand.vmem [shape: f32[4,64], index: 8, kind: input, shape index: {}]   ;;  %s1342_s9 = inlined_call_operand.hbm [shape: f32[16,64], index: 9, kind: output, shape index: {0}]   ;;  %s1343_s10 = inlined_call_operand.hbm [shape: f32[16,64], index: 10, kind: output, shape index: {1}]  }
   0x1   :  { %17 = vsyncpa [#allocation6], 0 }
   0x2   :  { %18 = vsyncpa [#allocation4], 0 }
   0x3   :  { %19 = vsyncpa [#allocation10], 0  ;;  %s1061_s13 = smov [#allocation5]   ;;  %s1062_s15 = smov [#allocation2]  }
   0x4   :  { %s37_s14 = sshll.u32 %s1061_s13, 4  ;;  %s25_s16 = sshll.u32 %s1062_s15, 4  ;;  %s38_s14 = int_to_ptr.vmem [resolvable:$true] %s37_s14  ;;  %s26_s16 = int_to_ptr.vmem [resolvable:$true] %s25_s16 }
   0x5   :  { %s961_s17 = scalar_lea.vmem %s38_s14, 256  ;;  %p966_p1 = scmp.lt.s32.totalorder %s38_s14, %s38_s14 }
   0x6   :  { %p962_p0 = scmp.ne.s32.totalorder %s38_s14, %s961_s17  ;;  %p967_p2 = scmp.lt.s32.totalorder %s961_s17, %s961_s17 }
   0x8   :  { %p968_p3 = por %p967_p2, %p966_p1 }
   0xa   :  { %p969_p4 = pnand %p968_p3, %p962_p0 }
   0xc   :  { %972 = shalt.err (!%p969_p4)
}
   0xd   :  { %s1063_s18 = smov 128   ;;  %s1064_s19 = smov 8  }
   0xe   :  { %43 = dma.hbm_to_vmem [thread:$0]  %s1334_s1, 256, %s38_s14, [#allocation6], %s1063_s18, %s1063_s18, %s1064_s19  }
   0xf   :  { %s981_s22 = scalar_lea.vmem %s26_s16, 256  ;;  %p986_p6 = scmp.lt.s32.totalorder %s26_s16, %s26_s16 }
  0x10   :  { %p982_p5 = scmp.ne.s32.totalorder %s26_s16, %s981_s22  ;;  %p987_p7 = scmp.lt.s32.totalorder %s981_s22, %s981_s22 }
  0x12   :  { %p988_p8 = por %p987_p7, %p986_p6 }
  0x14   :  { %p989_p9 = pnand %p988_p8, %p982_p5 }
  0x16   :  { %992 = shalt.err (!%p989_p9)
}
  0x17   :  { %31 = dma.hbm_to_vmem [thread:$0]  %s1333_s0, 256, %s26_s16, [#allocation3], %s1063_s18, %s1063_s18, %s1064_s19  }
  0x18   :  { %s1065_s25 = smov [#allocation7]  }
  0x19   :  { %s53_s26 = sshll.u32 %s1065_s25, 4  ;;  %s54_s26 = int_to_ptr.vmem [resolvable:$true] %s53_s26 }
  0x1a   :  { %s1001_s27 = scalar_lea.vmem %s54_s26, 2048  ;;  %p1006_p11 = scmp.lt.s32.totalorder %s54_s26, %s54_s26 }
  0x1b   :  { %p1002_p10 = scmp.ne.s32.totalorder %s54_s26, %s1001_s27  ;;  %p1007_p12 = scmp.lt.s32.totalorder %s1001_s27, %s1001_s27 }
  0x1d   :  { %p1008_p13 = por %p1007_p12, %p1006_p11 }
  0x1f   :  { %p1009_p0 = pnand %p1008_p13, %p1002_p10 }
  0x21   :  { %1012 = shalt.err (!%p1009_p0)
}
  0x22   :  { %59 = dma.hbm_to_vmem [thread:$0]  %s1337_s4, 2048, %s54_s26, [#allocation6], %s1063_s18, %s1063_s18, %s1064_s19  }
  0x23   :  { %1053 = dma.done.wait [#allocation3], 256  }
  0x24   :  { %1054 = vsyncadd [#allocation3], 4294967040 }
  0x25   :  { %1055 = dma.done.wait [#allocation6], 2304  }
  0x26   :  { %1056 = vsyncadd [#allocation6], 4294964992  ;;  %v123_v0 = vld [vmem:[%s1335_s2 + $0x38] sm:$0xff]  ;;  %v122_v1 = vld [vmem:[%s1335_s2 + $0x30] sm:$0xff]  ;;  %vm82_vm0 = vcmask 523264   ;;  %v110_v35 = vlaneseq  ;;  %s1066_s21 = smov [#allocation9]  }
  0x27   :  { %810 = vmatprep.subr.mxu0 %v123_v0  ;;  %v121_v2 = vld [vmem:[%s1335_s2 + $0x28] sm:$0xff]  ;;  %v80_v3 = vld [vmem:[#allocation2] sm:$0xff]  ;;  %v119_v9 = vld [vmem:[%s1335_s2 + $0x18] sm:$0xff]  ;;  %s727_s22 = sshll.u32 %s1066_s21, 4  ;;  %s728_s22 = int_to_ptr.vmem [resolvable:$true] %s727_s22 }
  0x28   :  { %811 = vmatpush3.msra.mxu0 %v123_v0  ;;  %v81_v4 = vld [vmem:[#allocation2 + $0x8] sm:$0xff]  ;;  %v120_v5 = vld [vmem:[%s1335_s2 + $0x20] sm:$0xff]  ;;  %v83_v6 = vsel %vm82_vm0, %v80_v3, 0.0  ;;  %v118_v11 = vld [vmem:[%s1335_s2 + $0x10] sm:$0xff]  ;;  %v1169_v36 = vshrl.u32 %v110_v35, 7  ;;  %p1018_p2 = scmp.lt.s32.totalorder %s728_s22, %s728_s22 }
  0x29   :  { %812 = vmatprep.subr.mxu0 %v122_v1  ;;  %v84_v7 = vsel %vm82_vm0, %v81_v4, 0.0  ;;  %v117_v13 = vld [vmem:[%s1335_s2 + $0x8] sm:$0xff]  ;;  %v116_v15 = vld [vmem:[%s1335_s2] sm:$0xff]  ;;  %v266_v44 = vld [vmem:[%s1336_s3 + $0x78] sm:$0xff] }
  0x2a   :  { %813 = vmatpush3.msra.mxu0 %v122_v1  ;;  %v85_v8 = vadd.f32 %v84_v7, %v83_v6  ;;  %v77_v37 = vld [vmem:[%s1339_s6] sm:$0x3]  ;;  %v1175_v38 = vsub.s32 0, %v1169_v36  ;;  %829 = vmatprep.subr.mxu1 %v266_v44  ;;  %v265_v45 = vld [vmem:[%s1336_s3 + $0x70] sm:$0xff]  ;;  %v264_v46 = vld [vmem:[%s1336_s3 + $0x68] sm:$0xff] }
  0x2b   :  { %814 = vmatprep.subr.mxu0 %v121_v2  ;;  %830 = vmatpush3.msra.mxu1 %v266_v44  ;;  %v263_v47 = vld [vmem:[%s1336_s3 + $0x60] sm:$0xff]  ;;  %v262_v48 = vld [vmem:[%s1336_s3 + $0x58] sm:$0xff]  ;;  %v261_v49 = vld [vmem:[%s1336_s3 + $0x50] sm:$0xff] }
  0x2c   :  { %815 = vmatpush3.msra.mxu0 %v121_v2  ;;  %v86_v10 = vrot.slane %v85_v8, 4  ;;  %831 = vmatprep.subr.mxu1 %v265_v45  ;;  %v260_v50 = vld [vmem:[%s1336_s3 + $0x48] sm:$0xff]  ;;  %v259_v51 = vld [vmem:[%s1336_s3 + $0x40] sm:$0xff]  ;;  %v258_v52 = vld [vmem:[%s1336_s3 + $0x38] sm:$0xff] }
  0x2d   :  { %816 = vmatprep.subr.mxu0 %v120_v5  ;;  %832 = vmatpush3.msra.mxu1 %v265_v45  ;;  %v257_v53 = vld [vmem:[%s1336_s3 + $0x30] sm:$0xff]  ;;  %v256_v54 = vld [vmem:[%s1336_s3 + $0x28] sm:$0xff]  ;;  %v255_v55 = vld [vmem:[%s1336_s3 + $0x20] sm:$0xff] }
  0x2e   :  { %817 = vmatpush3.msra.mxu0 %v120_v5  ;;  %v87_v12 = vadd.f32 %v86_v10, %v85_v8  ;;  %833 = vmatprep.subr.mxu1 %v264_v46  ;;  %v254_v56 = vld [vmem:[%s1336_s3 + $0x18] sm:$0xff]  ;;  %v253_v57 = vld [vmem:[%s1336_s3 + $0x10] sm:$0xff]  ;;  %v252_v58 = vld [vmem:[%s1336_s3 + $0x8] sm:$0xff] }
  0x2f   :  { %818 = vmatprep.subr.mxu0 %v119_v9  ;;  %834 = vmatpush3.msra.mxu1 %v264_v46  ;;  %v251_v59 = vld [vmem:[%s1336_s3] sm:$0xff]  ;;  %v397_v44 = vld [vmem:[#allocation7 + $0x48] sm:$0xff]  ;;  %v395_v46 = vld [vmem:[#allocation7 + $0x38] sm:$0xff] }
  0x30   :  { %819 = vmatpush3.msra.mxu0 %v119_v9  ;;  %v88_v14 = vrot.slane %v87_v12, 2  ;;  %835 = vmatprep.subr.mxu1 %v263_v47  ;;  %v396_v45 = vld [vmem:[#allocation7 + $0x40] sm:$0xff] }
  0x31   :  { %820 = vmatprep.subr.mxu0 %v118_v11  ;;  %836 = vmatpush3.msra.mxu1 %v263_v47  ;;  %v394_v47 = vld [vmem:[#allocation7 + $0x30] sm:$0xff] }
  0x32   :  { %821 = vmatpush3.msra.mxu0 %v118_v11  ;;  %v89_v16 = vadd.f32 %v88_v14, %v87_v12  ;;  %837 = vmatprep.subr.mxu1 %v262_v48 }
  0x33   :  { %822 = vmatprep.subr.mxu0 %v117_v13  ;;  %838 = vmatpush3.msra.mxu1 %v262_v48  ;;  %v393_v48 = vld [vmem:[#allocation7 + $0x28] sm:$0xff] }
  0x34   :  { %823 = vmatpush3.msra.mxu0 %v117_v13  ;;  %v90_v17 = vrot.slane %v89_v16, 1  ;;  %839 = vmatprep.subr.mxu1 %v261_v49 }
  0x35   :  { %824 = vmatprep.subr.mxu0 %v116_v15  ;;  %840 = vmatpush3.msra.mxu1 %v261_v49  ;;  %v392_v49 = vld [vmem:[#allocation7 + $0x20] sm:$0xff] }
  0x36   :  { %825 = vmatpush3.msra.mxu0 %v116_v15  ;;  %v91_v18 = vadd.f32 %v90_v17, %v89_v16  ;;  %841 = vmatprep.subr.mxu1 %v260_v50 }
  0x37   :  { %842 = vmatpush3.msra.mxu1 %v260_v50  ;;  %v391_v50 = vld [vmem:[#allocation7 + $0x18] sm:$0xff] }
  0x38   :  { %v92_v19 = vmul.f32 0.0625, %v91_v18  ;;  %843 = vmatprep.subr.mxu1 %v259_v51 }
  0x39   :  { %844 = vmatpush3.msra.mxu1 %v259_v51  ;;  %v390_v51 = vld [vmem:[#allocation7 + $0x10] sm:$0xff] }
  0x3a   :  { %v93_v20 = vsub.f32 %v80_v3, %v92_v19  ;;  %v94_v21 = vsub.f32 %v81_v4, %v92_v19  ;;  %845 = vmatprep.subr.mxu1 %v258_v52  ;;  %v1231_v19 = vld [vmem:[%s1340_s7] sm:$0x3f] }
  0x3b   :  { %846 = vmatpush3.msra.mxu1 %v258_v52  ;;  %v389_v52 = vld [vmem:[#allocation7 + $0x8] sm:$0xff] }
  0x3c   :  { %v95_v22 = vmul.f32 %v93_v20, %v93_v20  ;;  %v96_v23 = vmul.f32 %v94_v21, %v94_v21  ;;  %847 = vmatprep.subr.mxu1 %v257_v53 }
  0x3d   :  { %848 = vmatpush3.msra.mxu1 %v257_v53  ;;  %v388_v53 = vld [vmem:[#allocation7] sm:$0xff] }
  0x3e   :  { %v97_v24 = vsel %vm82_vm0, %v95_v22, 0.0  ;;  %v98_v25 = vsel %vm82_vm0, %v96_v23, 0.0  ;;  %849 = vmatprep.subr.mxu1 %v256_v54 }
  0x3f   :  { %v99_v26 = vadd.f32 %v98_v25, %v97_v24  ;;  %850 = vmatpush3.msra.mxu1 %v256_v54  ;;  %v241_v25 = vsub.s32 1, %v1169_v36 }
  0x40   :  { %851 = vmatprep.subr.mxu1 %v255_v55 }
  0x41   :  { %v100_v27 = vrot.slane %v99_v26, 4  ;;  %852 = vmatpush3.msra.mxu1 %v255_v55 }
  0x42   :  { %853 = vmatprep.subr.mxu1 %v254_v56 }
  0x43   :  { %v101_v28 = vadd.f32 %v100_v27, %v99_v26  ;;  %854 = vmatpush3.msra.mxu1 %v254_v56 }
  0x44   :  { %855 = vmatprep.subr.mxu1 %v253_v57 }
  0x45   :  { %v102_v29 = vrot.slane %v101_v28, 2  ;;  %856 = vmatpush3.msra.mxu1 %v253_v57 }
  0x46   :  { %857 = vmatprep.subr.mxu1 %v252_v58 }
  0x47   :  { %v103_v30 = vadd.f32 %v102_v29, %v101_v28  ;;  %858 = vmatpush3.msra.mxu1 %v252_v58 }
  0x48   :  { %859 = vmatprep.subr.mxu1 %v251_v59 }
  0x49   :  { %v104_v31 = vrot.slane %v103_v30, 1  ;;  %860 = vmatpush3.msra.mxu1 %v251_v59 }
  0x4b   :  { %v105_v32 = vadd.f32 %v104_v31, %v103_v30 }
  0x4d   :  { %v106_v33 = vmul.f32 0.0625, %v105_v32 }
  0x4f   :  { %v107_v34 = vadd.f32 1e-05, %v106_v33 }
  0x51   :  { %941 = vrsqrt.f32 %v107_v34 }
  0x5e   :  { %v942_v39 = vpop.eup %941 }
  0x5f   :  { %v109_v40 = vmul.f32 %v942_v39, %v77_v37  ;;  %v403_v37 = vld [vmem:[#allocation7 + $0x78] sm:$0xff]  ;;  %v402_v39 = vld [vmem:[#allocation7 + $0x70] sm:$0xff] }
  0x60   :  { %864 = vmatprep.subr.mxu0 %v403_v37 }
  0x61   :  { %v113_v41 = vrot.slane %v109_v40, %v1175_v38  ;;  %v401_v40 = vld [vmem:[#allocation7 + $0x68] sm:$0xff] }
  0x63   :  { %v114_v42 = vmul.f32 %v113_v41, %v80_v3  ;;  %v115_v43 = vmul.f32 %v113_v41, %v81_v4  ;;  %v400_v41 = vld [vmem:[#allocation7 + $0x60] sm:$0xff] }
  0x65   :  { %826 = vmatprep.mubr.msk.f32.mxu0 %vm82_vm0, %v114_v42  ;;  %v399_v42 = vld [vmem:[#allocation7 + $0x58] sm:$0xff] }
  0x66   :  { %827 = vmatmul.mubr.msk.f32.vlgmr.msra.gmra.mxu0 %vm82_vm0, %v115_v43  ;;  %v398_v43 = vld [vmem:[#allocation7 + $0x50] sm:$0xff] }
  0x67   :  { %865 = vmatpush3.msra.mxu0 %v403_v37  ;;  %v536_v37 = vld [vmem:[%s1338_s5 + $0x58] sm:$0xff] }
  0x68   :  { %866 = vmatprep.subr.mxu0 %v402_v39 }
  0x69   :  { %867 = vmatpush3.msra.mxu0 %v402_v39  ;;  %v535_v39 = vld [vmem:[%s1338_s5 + $0x50] sm:$0xff] }
  0x6a   :  { %868 = vmatprep.subr.mxu0 %v401_v40 }
  0x6b   :  { %869 = vmatpush3.msra.mxu0 %v401_v40  ;;  %v534_v40 = vld [vmem:[%s1338_s5 + $0x48] sm:$0xff] }
  0x6c   :  { %870 = vmatprep.subr.mxu0 %v400_v41 }
  0x6d   :  { %871 = vmatpush3.msra.mxu0 %v400_v41  ;;  %v533_v41 = vld [vmem:[%s1338_s5 + $0x40] sm:$0xff] }
  0x6e   :  { %872 = vmatprep.subr.mxu0 %v399_v42 }
  0x6f   :  { %873 = vmatpush3.msra.mxu0 %v399_v42  ;;  %v532_v42 = vld [vmem:[%s1338_s5 + $0x38] sm:$0xff] }
  0x70   :  { %874 = vmatprep.subr.mxu0 %v398_v43 }
  0x71   :  { %875 = vmatpush3.msra.mxu0 %v398_v43  ;;  %v531_v43 = vld [vmem:[%s1338_s5 + $0x30] sm:$0xff] }
  0x72   :  { %876 = vmatprep.subr.mxu0 %v397_v44 }
  0x73   :  { %877 = vmatpush3.msra.mxu0 %v397_v44  ;;  %v530_v44 = vld [vmem:[%s1338_s5 + $0x28] sm:$0xff] }
  0x74   :  { %878 = vmatprep.subr.mxu0 %v396_v45 }
  0x75   :  { %879 = vmatpush3.msra.mxu0 %v396_v45  ;;  %v529_v45 = vld [vmem:[%s1338_s5 + $0x20] sm:$0xff] }
  0x76   :  { %880 = vmatprep.subr.mxu0 %v395_v46 }
  0x77   :  { %881 = vmatpush3.msra.mxu0 %v395_v46  ;;  %v528_v46 = vld [vmem:[%s1338_s5 + $0x18] sm:$0xff] }
  0x78   :  { %882 = vmatprep.subr.mxu0 %v394_v47 }
  0x79   :  { %883 = vmatpush3.msra.mxu0 %v394_v47  ;;  %v527_v47 = vld [vmem:[%s1338_s5 + $0x10] sm:$0xff] }
  0x7a   :  { %884 = vmatprep.subr.mxu0 %v393_v48 }
  0x7b   :  { %885 = vmatpush3.msra.mxu0 %v393_v48  ;;  %v526_v48 = vld [vmem:[%s1338_s5 + $0x8] sm:$0xff] }
  0x7c   :  { %886 = vmatprep.subr.mxu0 %v392_v49 }
  0x7d   :  { %887 = vmatpush3.msra.mxu0 %v392_v49  ;;  %v525_v49 = vld [vmem:[%s1338_s5] sm:$0xff] }
  0x7e   :  { %888 = vmatprep.subr.mxu0 %v391_v50 }
  0x7f   :  { %889 = vmatpush3.msra.mxu0 %v391_v50 }
  0x80   :  { %890 = vmatprep.subr.mxu0 %v390_v51 }
  0x81   :  { %891 = vmatpush3.msra.mxu0 %v390_v51 }
  0x82   :  { %892 = vmatprep.subr.mxu0 %v389_v52 }
  0x83   :  { %893 = vmatpush3.msra.mxu0 %v389_v52 }
  0x84   :  { %894 = vmatprep.subr.mxu0 %v388_v53 }
  0x85   :  { %895 = vmatpush3.msra.mxu0 %v388_v53 }
 0x126   :  { %v828_v60 = vpop.f32.mrf.mxu0 }
 0x128   :  { %v196_v61 = vpop.f32.mrf.mxu0 }
 0x129   :  { %v205_v62 = vadd.f32 %v828_v60, %v196_v61 }
 0x12b   :  { %v206_v63 = vrot.slane %v205_v62, 4 }
 0x12d   :  { %v207_v0 = vadd.f32 %v206_v63, %v205_v62 }
 0x12f   :  { %v208_v1 = vrot.slane %v207_v0, 2 }
 0x131   :  { %v209_v2 = vadd.f32 %v208_v1, %v207_v0 }
 0x133   :  { %v210_v3 = vrot.slane %v209_v2, 1 }
 0x135   :  { %v211_v4 = vadd.f32 %v210_v3, %v209_v2 }
 0x137   :  { %v212_v5 = vmul.f32 0.0625, %v211_v4 }
 0x139   :  { %v213_v6 = vsub.f32 %v196_v61, %v212_v5  ;;  %v214_v7 = vsub.f32 %v828_v60, %v212_v5 }
 0x13b   :  { %v215_v8 = vmul.f32 %v213_v6, %v213_v6  ;;  %v216_v9 = vmul.f32 %v214_v7, %v214_v7 }
 0x13d   :  { %v217_v10 = vadd.f32 %v216_v9, %v215_v8 }
 0x13f   :  { %v218_v11 = vrot.slane %v217_v10, 4 }
 0x141   :  { %v219_v12 = vadd.f32 %v218_v11, %v217_v10 }
 0x143   :  { %v220_v13 = vrot.slane %v219_v12, 2 }
 0x145   :  { %v221_v14 = vadd.f32 %v220_v13, %v219_v12 }
 0x147   :  { %v222_v15 = vrot.slane %v221_v14, 1 }
 0x149   :  { %v223_v16 = vadd.f32 %v222_v15, %v221_v14  ;;  %v372_v15 = vsub.s32 2, %v1169_v36 }
 0x14b   :  { %v224_v17 = vmul.f32 0.0625, %v223_v16 }
 0x14d   :  { %v225_v18 = vadd.f32 1e-05, %v224_v17 }
 0x14f   :  { %943 = vrsqrt.f32 %v225_v18 }
 0x15c   :  { %v944_v20 = vpop.eup %943 }
 0x15d   :  { %v227_v21 = vmul.f32 %v944_v20, %v1231_v19  ;;  %v378_v20 = vsub.s32 3, %v1169_v36 }
 0x15f   :  { %v228_v22 = vmul.f32 %v227_v21, %v212_v5  ;;  %v236_v24 = vrot.slane %v227_v21, %v1175_v38 }
 0x161   :  { %v230_v23 = vrot.slane %v228_v22, 7  ;;  %v237_v27 = vmul.f32 %v236_v24, %v196_v61  ;;  %v238_v28 = vmul.f32 %v828_v60, %v236_v24 }
 0x163   :  { %v232_v26 = vsub.f32 %v1231_v19, %v230_v23 }
 0x165   :  { %v242_v29 = vrot.slane %v232_v26, %v241_v25 }
 0x167   :  { %v243_v30 = vadd.f32 %v242_v29, %v237_v27  ;;  %v244_v31 = vadd.f32 %v242_v29, %v238_v28 }
 0x169   :  { %vm245_vm1 = vcmp.ge.f32.partialorder %v243_v30, 0.0  ;;  %v247_v32 = vmul.f32 0.01, %v243_v30  ;;  %vm246_vm2 = vcmp.ge.f32.partialorder %v244_v31, 0.0  ;;  %v248_v33 = vmul.f32 0.01, %v244_v31 }
 0x16b   :  { %v249_v34 = vsel %vm245_vm1, %v243_v30, %v247_v32  ;;  %v250_v35 = vsel %vm246_vm2, %v244_v31, %v248_v33  ;;  %v540_v32 = vld [vmem:[%s1338_s5 + $0x78] sm:$0xff]  ;;  %v539_v33 = vld [vmem:[%s1338_s5 + $0x70] sm:$0xff] }
 0x16c   :  { %861 = vmatprep.mubr.f32.mxu1 %v249_v34  ;;  %899 = vmatprep.subr.mxu1 %v540_v32  ;;  %v538_v34 = vld [vmem:[%s1338_s5 + $0x68] sm:$0xff] }
 0x16d   :  { %862 = vmatmul.mubr.f32.vlgmr.msra.gmra.mxu1 %v250_v35  ;;  %v537_v35 = vld [vmem:[%s1338_s5 + $0x60] sm:$0xff] }
 0x16e   :  { %900 = vmatpush3.msra.mxu1 %v540_v32 }
 0x16f   :  { %901 = vmatprep.subr.mxu1 %v539_v33 }
 0x170   :  { %902 = vmatpush3.msra.mxu1 %v539_v33 }
 0x171   :  { %903 = vmatprep.subr.mxu1 %v538_v34 }
 0x172   :  { %904 = vmatpush3.msra.mxu1 %v538_v34 }
 0x173   :  { %905 = vmatprep.subr.mxu1 %v537_v35 }
 0x174   :  { %906 = vmatpush3.msra.mxu1 %v537_v35 }
 0x175   :  { %907 = vmatprep.subr.mxu1 %v536_v37 }
 0x176   :  { %908 = vmatpush3.msra.mxu1 %v536_v37 }
 0x177   :  { %909 = vmatprep.subr.mxu1 %v535_v39 }
 0x178   :  { %910 = vmatpush3.msra.mxu1 %v535_v39 }
 0x179   :  { %911 = vmatprep.subr.mxu1 %v534_v40 }
 0x17a   :  { %912 = vmatpush3.msra.mxu1 %v534_v40 }
 0x17b   :  { %913 = vmatprep.subr.mxu1 %v533_v41 }
 0x17c   :  { %914 = vmatpush3.msra.mxu1 %v533_v41 }
 0x17d   :  { %915 = vmatprep.subr.mxu1 %v532_v42 }
 0x17e   :  { %916 = vmatpush3.msra.mxu1 %v532_v42 }
 0x17f   :  { %917 = vmatprep.subr.mxu1 %v531_v43 }
 0x180   :  { %918 = vmatpush3.msra.mxu1 %v531_v43 }
 0x181   :  { %919 = vmatprep.subr.mxu1 %v530_v44 }
 0x182   :  { %920 = vmatpush3.msra.mxu1 %v530_v44 }
 0x183   :  { %921 = vmatprep.subr.mxu1 %v529_v45 }
 0x184   :  { %922 = vmatpush3.msra.mxu1 %v529_v45 }
 0x185   :  { %923 = vmatprep.subr.mxu1 %v528_v46 }
 0x186   :  { %924 = vmatpush3.msra.mxu1 %v528_v46 }
 0x187   :  { %925 = vmatprep.subr.mxu1 %v527_v47 }
 0x188   :  { %926 = vmatpush3.msra.mxu1 %v527_v47 }
 0x189   :  { %927 = vmatprep.subr.mxu1 %v526_v48 }
 0x18a   :  { %928 = vmatpush3.msra.mxu1 %v526_v48 }
 0x18b   :  { %929 = vmatprep.subr.mxu1 %v525_v49 }
 0x18c   :  { %930 = vmatpush3.msra.mxu1 %v525_v49 }
 0x22d   :  { %v863_v54 = vpop.f32.mrf.mxu1 }
 0x22f   :  { %v333_v55 = vpop.f32.mrf.mxu1 }
 0x230   :  { %v342_v56 = vadd.f32 %v863_v54, %v333_v55 }
 0x232   :  { %v343_v57 = vrot.slane %v342_v56, 4 }
 0x234   :  { %v344_v58 = vadd.f32 %v343_v57, %v342_v56 }
 0x236   :  { %v345_v59 = vrot.slane %v344_v58, 2 }
 0x238   :  { %v346_v60 = vadd.f32 %v345_v59, %v344_v58 }
 0x23a   :  { %v347_v61 = vrot.slane %v346_v60, 1 }
 0x23c   :  { %v348_v62 = vadd.f32 %v347_v61, %v346_v60 }
 0x23e   :  { %v349_v63 = vmul.f32 0.0625, %v348_v62 }
 0x240   :  { %v350_v0 = vsub.f32 %v333_v55, %v349_v63  ;;  %v351_v1 = vsub.f32 %v863_v54, %v349_v63 }
 0x242   :  { %v352_v2 = vmul.f32 %v350_v0, %v350_v0  ;;  %v353_v3 = vmul.f32 %v351_v1, %v351_v1 }
 0x244   :  { %v354_v4 = vadd.f32 %v353_v3, %v352_v2 }
 0x246   :  { %v355_v5 = vrot.slane %v354_v4, 4 }
 0x248   :  { %v356_v6 = vadd.f32 %v355_v5, %v354_v4 }
 0x24a   :  { %v357_v7 = vrot.slane %v356_v6, 2 }
 0x24c   :  { %v358_v8 = vadd.f32 %v357_v7, %v356_v6 }
 0x24e   :  { %v359_v9 = vrot.slane %v358_v8, 1 }
 0x250   :  { %v360_v10 = vadd.f32 %v359_v9, %v358_v8 }
 0x252   :  { %v361_v11 = vmul.f32 0.0625, %v360_v10 }
 0x254   :  { %v362_v12 = vadd.f32 1e-05, %v361_v11  ;;  %v509_v11 = vsub.s32 4, %v1169_v36 }
 0x256   :  { %945 = vrsqrt.f32 %v362_v12 }
 0x263   :  { %v946_v13 = vpop.eup %945 }
 0x264   :  { %v364_v14 = vmul.f32 %v946_v13, %v1231_v19 }
 0x266   :  { %v365_v16 = vmul.f32 %v364_v14, %v349_v63  ;;  %v373_v18 = vrot.slane %v364_v14, %v372_v15 }
 0x268   :  { %v367_v17 = vrot.slane %v365_v16, 7  ;;  %v374_v22 = vmul.f32 %v373_v18, %v333_v55  ;;  %v375_v23 = vmul.f32 %v863_v54, %v373_v18  ;;  %v515_v16 = vsub.s32 5, %v1169_v36 }
 0x26a   :  { %v369_v21 = vsub.f32 %v1231_v19, %v367_v17 }
 0x26c   :  { %v379_v24 = vrot.slane %v369_v21, %v378_v20 }
 0x26e   :  { %v380_v26 = vadd.f32 %v379_v24, %v374_v22  ;;  %v381_v27 = vadd.f32 %v379_v24, %v375_v23 }
 0x270   :  { %vm382_vm3 = vcmp.ge.f32.partialorder %v380_v26, 0.0  ;;  %v384_v28 = vmul.f32 0.01, %v380_v26  ;;  %vm383_vm4 = vcmp.ge.f32.partialorder %v381_v27, 0.0  ;;  %v385_v29 = vmul.f32 0.01, %v381_v27 }
 0x272   :  { %v386_v30 = vsel %vm382_vm3, %v380_v26, %v384_v28  ;;  %v387_v31 = vsel %vm383_vm4, %v381_v27, %v385_v29 }
 0x273   :  { %896 = vmatprep.mubr.f32.mxu0 %v386_v30  ;;  %v662_v30 = vld [vmem:[#allocation5] sm:$0xff] }
 0x274   :  { %897 = vmatmul.mubr.f32.vlgmr.msra.gmra.mxu0 %v387_v31  ;;  %v663_v31 = vld [vmem:[#allocation5 + $0x8] sm:$0xff]  ;;  %v664_v32 = vsel %vm82_vm0, %v662_v30, 0.0 }
 0x275   :  { %v665_v33 = vsel %vm82_vm0, %v663_v31, 0.0 }
 0x334   :  { %v898_v50 = vpop.f32.mrf.mxu0 }
 0x336   :  { %v470_v51 = vpop.f32.mrf.mxu0 }
 0x337   :  { %v479_v52 = vadd.f32 %v898_v50, %v470_v51 }
 0x339   :  { %v480_v53 = vrot.slane %v479_v52, 4 }
 0x33b   :  { %v481_v54 = vadd.f32 %v480_v53, %v479_v52 }
 0x33d   :  { %v482_v55 = vrot.slane %v481_v54, 2 }
 0x33f   :  { %v483_v56 = vadd.f32 %v482_v55, %v481_v54 }
 0x341   :  { %v484_v57 = vrot.slane %v483_v56, 1 }
 0x343   :  { %v485_v58 = vadd.f32 %v484_v57, %v483_v56 }
 0x345   :  { %v486_v59 = vmul.f32 0.0625, %v485_v58 }
 0x347   :  { %v487_v60 = vsub.f32 %v470_v51, %v486_v59  ;;  %v488_v61 = vsub.f32 %v898_v50, %v486_v59 }
 0x349   :  { %v489_v62 = vmul.f32 %v487_v60, %v487_v60  ;;  %v490_v63 = vmul.f32 %v488_v61, %v488_v61 }
 0x34b   :  { %v491_v0 = vadd.f32 %v490_v63, %v489_v62 }
 0x34d   :  { %v492_v1 = vrot.slane %v491_v0, 4 }
 0x34f   :  { %v493_v2 = vadd.f32 %v492_v1, %v491_v0 }
 0x351   :  { %v494_v3 = vrot.slane %v493_v2, 2 }
 0x353   :  { %v495_v4 = vadd.f32 %v494_v3, %v493_v2 }
 0x355   :  { %v496_v5 = vrot.slane %v495_v4, 1 }
 0x357   :  { %v497_v6 = vadd.f32 %v496_v5, %v495_v4 }
 0x359   :  { %v498_v7 = vmul.f32 0.0625, %v497_v6 }
 0x35b   :  { %v499_v8 = vadd.f32 1e-05, %v498_v7 }
 0x35d   :  { %947 = vrsqrt.f32 %v499_v8 }
 0x36a   :  { %v948_v9 = vpop.eup %947 }
 0x36b   :  { %v501_v10 = vmul.f32 %v948_v9, %v1231_v19 }
 0x36d   :  { %v502_v12 = vmul.f32 %v501_v10, %v486_v59  ;;  %v510_v14 = vrot.slane %v501_v10, %v509_v11  ;;  %v79_v59 = vld [vmem:[%s1341_s8] sm:$0xf]  ;;  %s1013_s8 = scalar_lea.vmem %s728_s22, 256 }
 0x36e   :  { %p1014_p1 = scmp.ne.s32.totalorder %s728_s22, %s1013_s8  ;;  %p1019_p3 = scmp.lt.s32.totalorder %s1013_s8, %s1013_s8 }
 0x36f   :  { %v504_v13 = vrot.slane %v502_v12, 7  ;;  %v511_v18 = vmul.f32 %v510_v14, %v470_v51  ;;  %v512_v21 = vmul.f32 %v898_v50, %v510_v14 }
 0x370   :  { %p1020_p4 = por %p1019_p3, %p1018_p2 }
 0x371   :  { %v506_v17 = vsub.f32 %v1231_v19, %v504_v13  ;;  %v666_v19 = vadd.f32 %v665_v33, %v664_v32 }
 0x372   :  { %p1021_p5 = pnand %p1020_p4, %p1014_p1 }
 0x373   :  { %v516_v22 = vrot.slane %v506_v17, %v515_v16  ;;  %v667_v34 = vrot.slane %v666_v19, 4 }
 0x375   :  { %v517_v23 = vadd.f32 %v516_v22, %v511_v18  ;;  %v518_v24 = vadd.f32 %v516_v22, %v512_v21  ;;  %v668_v35 = vadd.f32 %v667_v34, %v666_v19 }
 0x377   :  { %vm519_vm5 = vcmp.ge.f32.partialorder %v517_v23, 0.0  ;;  %v521_v26 = vmul.f32 0.01, %v517_v23  ;;  %vm520_vm6 = vcmp.ge.f32.partialorder %v518_v24, 0.0  ;;  %v522_v27 = vmul.f32 0.01, %v518_v24 }
 0x378   :  { %v669_v37 = vrot.slane %v668_v35, 2 }
 0x379   :  { %v523_v28 = vsel %vm519_vm5, %v517_v23, %v521_v26  ;;  %v524_v29 = vsel %vm520_vm6, %v518_v24, %v522_v27 }
 0x37a   :  { %931 = vmatprep.mubr.f32.mxu1 %v523_v28  ;;  %v670_v39 = vadd.f32 %v669_v37, %v668_v35 }
 0x37b   :  { %932 = vmatmul.mubr.f32.vlgmr.msra.gmra.mxu1 %v524_v29 }
 0x37c   :  { %v671_v40 = vrot.slane %v670_v39, 1 }
 0x37e   :  { %v672_v41 = vadd.f32 %v671_v40, %v670_v39 }
 0x380   :  { %v673_v42 = vmul.f32 0.0625, %v672_v41 }
 0x382   :  { %v674_v43 = vsub.f32 %v662_v30, %v673_v42  ;;  %v675_v44 = vsub.f32 %v663_v31, %v673_v42 }
 0x384   :  { %v676_v45 = vmul.f32 %v674_v43, %v674_v43  ;;  %v677_v46 = vmul.f32 %v675_v44, %v675_v44 }
 0x386   :  { %v678_v47 = vsel %vm82_vm0, %v676_v45, 0.0  ;;  %v679_v48 = vsel %vm82_vm0, %v677_v46, 0.0 }
 0x387   :  { %v680_v49 = vadd.f32 %v679_v48, %v678_v47 }
 0x389   :  { %v681_v50 = vrot.slane %v680_v49, 4 }
 0x38b   :  { %v682_v51 = vadd.f32 %v681_v50, %v680_v49 }
 0x38d   :  { %v683_v52 = vrot.slane %v682_v51, 2 }
 0x38f   :  { %v684_v53 = vadd.f32 %v683_v52, %v682_v51 }
 0x391   :  { %v685_v54 = vrot.slane %v684_v53, 1 }
 0x393   :  { %v686_v55 = vadd.f32 %v685_v54, %v684_v53 }
 0x395   :  { %v687_v56 = vmul.f32 0.0625, %v686_v55 }
 0x397   :  { %v688_v57 = vadd.f32 1e-05, %v687_v56 }
 0x399   :  { %949 = vrsqrt.f32 %v688_v57 }
 0x3a6   :  { %v950_v58 = vpop.eup %949 }
 0x3a7   :  { %v690_v60 = vmul.f32 %v950_v58, %v79_v59 }
 0x3a9   :  { %v691_v61 = vmul.f32 %v690_v60, %v673_v42  ;;  %v699_v62 = vrot.slane %v690_v60, %v372_v15 }
 0x3ab   :  { %v693_v63 = vrot.slane %v691_v61, 7  ;;  %v700_v1 = vmul.f32 %v699_v62, %v662_v30  ;;  %v701_v2 = vmul.f32 %v699_v62, %v663_v31 }
 0x3ad   :  { %v695_v0 = vsub.f32 %v79_v59, %v693_v63 }
 0x3af   :  { %v705_v3 = vrot.slane %v695_v0, %v378_v20 }
 0x3b1   :  { %v706_v4 = vadd.f32 %v705_v3, %v700_v1  ;;  %v707_v5 = vadd.f32 %v705_v3, %v701_v2 }
 0x3b3   :  { %708 = vst.msk [vmem:[#allocation9] sm:$0xff] %vm82_vm0, %v706_v4  ;;  %709 = vst.msk [vmem:[#allocation9 + $0x8] sm:$0xff] %vm82_vm0, %v707_v5 }
 0x3b4   :  { %1024 = shalt.err (!%p1021_p5)
}
 0x3b5   :  { %733 = dma.vmem_to_hbm [thread:$0]  %s728_s22, 256, %s1343_s10, [#allocation10], %s1063_s18, %s1063_s18, %s1064_s19  }
 0x3b6   :  { %s1067_s10 = smov [#allocation8]  }
 0x3b7   :  { %s715_s2 = sshll.u32 %s1067_s10, 4  ;;  %s716_s2 = int_to_ptr.vmem [resolvable:$true] %s715_s2 }
 0x3b8   :  { %s1033_s25 = scalar_lea.vmem %s716_s2, 256  ;;  %p1038_p7 = scmp.lt.s32.totalorder %s716_s2, %s716_s2 }
 0x3b9   :  { %p1034_p6 = scmp.ne.s32.totalorder %s716_s2, %s1033_s25  ;;  %p1039_p8 = scmp.lt.s32.totalorder %s1033_s25, %s1033_s25 }
 0x3bb   :  { %p1040_p9 = por %p1039_p8, %p1038_p7 }
 0x3bd   :  { %p1041_p10 = pnand %p1040_p9, %p1034_p6 }
 0x43b   :  { %v933_v15 = vpop.f32.mrf.mxu1 }
 0x43c   :  { %v617_v6 = vsel %vm82_vm0, %v933_v15, 0.0 }
 0x43d   :  { %v607_v20 = vpop.f32.mrf.mxu1 }
 0x43e   :  { %v616_v7 = vsel %vm82_vm0, %v607_v20, 0.0 }
 0x43f   :  { %v618_v8 = vadd.f32 %v617_v6, %v616_v7 }
 0x441   :  { %v619_v9 = vrot.slane %v618_v8, 4 }
 0x443   :  { %v620_v10 = vadd.f32 %v619_v9, %v618_v8 }
 0x445   :  { %v621_v11 = vrot.slane %v620_v10, 2 }
 0x447   :  { %v622_v12 = vadd.f32 %v621_v11, %v620_v10 }
 0x449   :  { %v623_v13 = vrot.slane %v622_v12, 1 }
 0x44b   :  { %v624_v14 = vadd.f32 %v623_v13, %v622_v12 }
 0x44d   :  { %v625_v16 = vmul.f32 0.0625, %v624_v14 }
 0x44f   :  { %v626_v17 = vsub.f32 %v607_v20, %v625_v16  ;;  %v627_v18 = vsub.f32 %v933_v15, %v625_v16 }
 0x451   :  { %v628_v21 = vmul.f32 %v626_v17, %v626_v17  ;;  %v629_v22 = vmul.f32 %v627_v18, %v627_v18 }
 0x453   :  { %v630_v23 = vsel %vm82_vm0, %v628_v21, 0.0  ;;  %v631_v24 = vsel %vm82_vm0, %v629_v22, 0.0 }
 0x454   :  { %v632_v26 = vadd.f32 %v631_v24, %v630_v23 }
 0x456   :  { %v633_v27 = vrot.slane %v632_v26, 4 }
 0x458   :  { %v634_v28 = vadd.f32 %v633_v27, %v632_v26 }
 0x45a   :  { %v635_v29 = vrot.slane %v634_v28, 2 }
 0x45c   :  { %v636_v30 = vadd.f32 %v635_v29, %v634_v28 }
 0x45e   :  { %v637_v31 = vrot.slane %v636_v30, 1 }
 0x460   :  { %v638_v32 = vadd.f32 %v637_v31, %v636_v30 }
 0x462   :  { %v639_v33 = vmul.f32 0.0625, %v638_v32 }
 0x464   :  { %v640_v19 = vadd.f32 1e-05, %v639_v33 }
 0x466   :  { %951 = vrsqrt.f32 %v640_v19 }
 0x473   :  { %v952_v34 = vpop.eup %951 }
 0x474   :  { %v642_v35 = vmul.f32 %v952_v34, %v79_v59 }
 0x476   :  { %v643_v37 = vmul.f32 %v642_v35, %v625_v16  ;;  %v651_v40 = vrot.slane %v642_v35, %v1175_v38 }
 0x478   :  { %v645_v39 = vrot.slane %v643_v37, 7  ;;  %v652_v42 = vmul.f32 %v651_v40, %v607_v20  ;;  %v653_v43 = vmul.f32 %v933_v15, %v651_v40 }
 0x47a   :  { %v647_v41 = vsub.f32 %v79_v59, %v645_v39 }
 0x47c   :  { %v657_v44 = vrot.slane %v647_v41, %v241_v25 }
 0x47e   :  { %v658_v45 = vadd.f32 %v657_v44, %v652_v42  ;;  %v659_v46 = vadd.f32 %v657_v44, %v653_v43 }
 0x480   :  { %660 = vst.msk [vmem:[#allocation8] sm:$0xff] %vm82_vm0, %v658_v45  ;;  %661 = vst.msk [vmem:[#allocation8 + $0x8] sm:$0xff] %vm82_vm0, %v659_v46 }
 0x481   :  { %1044 = shalt.err (!%p1041_p10)
}
 0x482   :  { %721 = dma.vmem_to_hbm [thread:$0]  %s716_s2, 256, %s1342_s9, [#allocation4], %s1063_s18, %s1063_s18, %s1064_s19  }
 0x483   :  { %1057 = dma.done.wait [#allocation4], 256  }
 0x484   :  { %1058 = vsyncadd [#allocation4], 4294967040 }
 0x485   :  { %1059 = dma.done.wait [#allocation10], 256  }
 0x486   :  { %1060 = vsyncadd [#allocation10], 4294967040 }
 0x487   :  { %740 = vsyncpa [#allocation3], 1 }
 0x488   :  { %741 = vsyncpa [#allocation6], 1 }
 0x489   :  { %742 = vsyncpa [#allocation4], 1 }
 0x48a   :  { %743 = vsyncpa [#allocation10], 1 }

</bundles_post_ra>
